<compile_context>
chip_gen: v7x
topology: tpu7x:2x2x1
jax: 0.10.0
libtpu: 0.0.40
codegen_flags: <defaults>
</compile_context>

<pallas_src>
import functools

import jax
import jax.numpy as jnp
from jax.experimental import pallas as pl
from jax.experimental.pallas import tpu as pltpu


# ----------------------------------------------------------------------------- kernel
def fusion_kernel(p_ref, t_ref, w_ref, b_ref, out_ref, *, C, ew_dtype):
    # p_ref/t_ref: (C, TN) in caller dtype (f32 or bf16)
    # w_ref: (3, 2C, 2C) bf16 ; b_ref: (3, 2C, 1) f32 ; out_ref: (2C, TN)
    # Cast features to bf16 in VMEM right before the MXU (no separate XLA pass).
    pb = p_ref[...].astype(jnp.bfloat16)
    tb = t_ref[...].astype(jnp.bfloat16)

    # fc1 (block-diagonal) as two small-K MXU pushes -- no (2C, TN) concat copy.
    # v1 = [relu(Wp1 @ p + bp1) ; relu(Wt1 @ t + bt1)]
    w1 = w_ref[0]
    v1_acc = (jnp.dot(w1[:, :C], pb, preferred_element_type=jnp.float32)
              + jnp.dot(w1[:, C:], tb, preferred_element_type=jnp.float32)
              + b_ref[0])
    v1 = jnp.maximum(v1_acc, 0.0).astype(ew_dtype)
    v1b = v1.astype(jnp.bfloat16)

    # attention path (ANTI-block-diag weight): gate = [att_t2p ; att_p2t]
    # -- already cross-swapped, no in-kernel roll needed.
    gate_acc = jnp.dot(w_ref[1], v1b, preferred_element_type=jnp.float32) + b_ref[1]
    gate = jax.nn.sigmoid(jnp.maximum(gate_acc, 0.0).astype(ew_dtype))

    # fc2 (block-diag): v2 = [pv2 ; tv2]  (no ReLU)
    v2 = (jnp.dot(w_ref[2], v1b, preferred_element_type=jnp.float32)
          + b_ref[2]).astype(ew_dtype)

    # gated residual fusion, already in concatenated [point_fusion ; trans_fusion]
    # order -> one contiguous lane-dense (2C, TN) store.
    out_ref[...] = jnp.maximum(v1 + gate * v2, 0.0).astype(out_ref.dtype)


# ----------------------------------------------------------------------------- helpers
def _round_up(x, m):
    return (x + m - 1) // m * m


def _default_elementwise_dtype():
    """bf16 elementwise on chips with a bf16 VPU/EUP (v6e/v7x), f32 otherwise."""
    try:
        kind = jax.devices()[0].device_kind.lower()
    except Exception:  # pragma: no cover - conservative fallback
        return jnp.float32
    if any(v in kind for v in ("v2", "v3", "v4", "v5")):
        return jnp.float32
    return jnp.bfloat16


def _auto_tile_n(B, N, cap=8192):
    """Lane-tile size: large lane-dense tiles (multiple of 128); pad-friendly."""
    cap = max(128, cap - cap % 128)
    if B == 1 and N > 128:
        # keep >=2 grid steps so both v7x TensorCores get work
        cap = min(cap, max(128, _round_up((N + 1) // 2, 128)))
    if N <= cap:
        return _round_up(N, 128)
    n128 = _round_up(N, 128)
    # prefer an exact divisor of the 128-padded N near the cap (no pad waste) ...
    for cand in range(cap, cap // 2, -128):
        if n128 % cand == 0:
            return cand
    # ... otherwise just use the cap and pad N up to a multiple of it.
    return cap


# ----------------------------------------------------------------------------- wrapper
def bidirectional_trans_fusion(point_features, trans_features, packed_w, packed_b,
                               *, tile_n=None, out_dtype=jnp.bfloat16,
                               elementwise_dtype=None):
    """Fused BidirectionalTransFusion forward.

    point_features, trans_features: (B, C, N) (f32 or bf16).  Returns (B, 2C, N)
    in `out_dtype` (bf16 by default to halve output HBM traffic).
    Notes: matmul operands are bf16 (f32 accumulation); Conv+BatchNorm pairs are
    folded in eval/inference mode (running stats).
    """
    B, C, N = point_features.shape
    assert trans_features.shape == (B, C, N)
    C2 = packed_w.shape[-1]
    assert packed_w.shape == (3, C2, C2) and packed_b.shape == (3, C2, 1)
    assert C2 == 2 * C

    if elementwise_dtype is None:
        elementwise_dtype = _default_elementwise_dtype()
    if tile_n is None:
        tile_n = _auto_tile_n(B, N)
    assert tile_n % 128 == 0 or tile_n == N

    # Pad N up to a multiple of tile_n (sliced off below) instead of collapsing
    # to tiny tiles when N has awkward factors.
    n_pad = _round_up(N, tile_n)
    p, t = point_features, trans_features
    if n_pad != N:
        pad = ((0, 0), (0, 0), (0, n_pad - N))
        p = jnp.pad(p, pad)
        t = jnp.pad(t, pad)

    grid = (B, n_pad // tile_n)

    feat_spec = pl.BlockSpec((pl.Squeezed(), C, tile_n), lambda b, n: (b, 0, n))
    w_spec = pl.BlockSpec((3, C2, C2), lambda b, n: (0, 0, 0))
    bias_spec = pl.BlockSpec((3, C2, 1), lambda b, n: (0, 0, 0))
    out_spec = pl.BlockSpec((pl.Squeezed(), C2, tile_n), lambda b, n: (b, 0, n))

    kernel = functools.partial(fusion_kernel, C=C, ew_dtype=elementwise_dtype)

    out = pl.pallas_call(
        kernel,
        out_shape=jax.ShapeDtypeStruct((B, C2, n_pad), out_dtype),
        grid_spec=pl.GridSpec(
            grid=grid,
            in_specs=[feat_spec, feat_spec, w_spec, bias_spec],
            out_specs=out_spec,
        ),
        compiler_params=pltpu.CompilerParams(
            dimension_semantics=("parallel", "parallel")),
    )(p, t, packed_w, packed_b)

    if n_pad != N:
        out = out[..., :N]
    return out


# ----------------------------------------------------------------------------- params
def _fold_conv_bn(key, C, conv_has_bias, eps=1e-5):
    """Deterministic Conv1d(k=1) + BatchNorm1d (eval mode) params folded to (W, b)."""
    k_w, k_b, k_g, k_be, k_m, k_v = jax.random.split(key, 6)
    bound = (6.0 / C) ** 0.5  # kaiming_uniform, fan_in = C
    W = jax.random.uniform(k_w, (C, C), jnp.float32, minval=-bound, maxval=bound)
    conv_b = (jax.random.uniform(k_b, (C,), jnp.float32,
                                 minval=-1.0 / C ** 0.5, maxval=1.0 / C ** 0.5)
              if conv_has_bias else jnp.zeros((C,), jnp.float32))
    gamma = jax.random.uniform(k_g, (C,), jnp.float32, minval=0.5, maxval=1.5)
    beta = 0.1 * jax.random.normal(k_be, (C,), jnp.float32)
    mean = 0.1 * jax.random.normal(k_m, (C,), jnp.float32)
    var = jax.random.uniform(k_v, (C,), jnp.float32, minval=0.5, maxval=1.5)

    scale = gamma / jnp.sqrt(var + eps)
    W_eff = scale[:, None] * W
    b_eff = scale * (conv_b - mean) + beta
    return W_eff, b_eff[:, None]            # bias as (C, 1) for lane broadcast


def make_params(key, C):
    keys = jax.random.split(key, 6)
    # order: point_fc1, trans_fc1, point_att_path, trans_att_path, point_fc2, trans_fc2
    has_bias = [False, False, True, True, False, False]
    return tuple(_fold_conv_bn(k, C, hb) for k, hb in zip(keys, has_bias))


def pack_params(params, C):
    """Pack 6 folded (W, b) pairs into (3, 2C, 2C) bf16 weights + (3, 2C, 1) f32 biases."""
    (wp1, bp1), (wt1, bt1), (wpa, bpa), (wta, bta), (wp2, bp2), (wt2, bt2) = params
    z = jnp.zeros((C, C), jnp.float32)
    w1 = jnp.block([[wp1, z], [z, wt1]])
    # Anti-block-diagonal: row block 0 computes att_trans_to_point from trans_v1,
    # row block 1 computes att_point_to_trans from point_v1, so the gate emerges
    # already cross-swapped ([att_t2p ; att_p2t]) -- no in-kernel roll needed.
    wa = jnp.block([[z, wta], [wpa, z]])
    w2 = jnp.block([[wp2, z], [z, wt2]])
    w_packed = jnp.stack([w1, wa, w2]).astype(jnp.bfloat16)            # (3, 2C, 2C)
    b_packed = jnp.stack([jnp.concatenate([bp1, bt1], axis=0),
                          jnp.concatenate([bta, bpa], axis=0),
                          jnp.concatenate([bp2, bt2], axis=0)])        # (3, 2C, 1) f32
    return w_packed, b_packed


# ----------------------------------------------------------------------------- reference
def ref_forward(p, t, params, elementwise_dtype=jnp.float32, out_dtype=jnp.bfloat16):
    """Plain (unfused) forward mirroring the kernel's precision choices
    (bf16 matmul operands, f32 accumulation + bias, `elementwise_dtype` gating math)."""
    (wp1, bp1), (wt1, bt1), (wpa, bpa), (wta, bta), (wp2, bp2), (wt2, bt2) = params
    ew = elementwise_dtype

    def mm(w, b, x):  # folded Conv1d(k=1)+BN over the channel axis
        return jnp.einsum('oc,bcn->bon', w.astype(jnp.bfloat16), x.astype(jnp.bfloat16),
                          preferred_element_type=jnp.float32) + b[None, :, :]

    pv1 = jax.nn.relu(mm(wp1, bp1, p)).astype(ew)
    tv1 = jax.nn.relu(mm(wt1, bt1, t)).astype(ew)
    att_p2t = jax.nn.sigmoid(jax.nn.relu(mm(wpa, bpa, pv1)).astype(ew))
    att_t2p = jax.nn.sigmoid(jax.nn.relu(mm(wta, bta, tv1)).astype(ew))
    pv2 = mm(wp2, bp2, pv1).astype(ew)
    tv2 = mm(wt2, bt2, tv1).astype(ew)
    pf = jax.nn.relu(pv1 + att_t2p * pv2)
    tf = jax.nn.relu(tv1 + att_p2t * tv2)
    return jnp.concatenate([pf, tf], axis=1).astype(out_dtype)


# ----------------------------------------------------------------------------- main
if __name__ == "__main__":
    B, C, N = 2, 32, 256  # num_filter = 32

    key = jax.random.PRNGKey(0)
    k_p, k_t, k_params = jax.random.split(key, 3)
    point_features = jax.random.normal(k_p, (B, C, N), jnp.float32)
    trans_features = jax.random.normal(k_t, (B, C, N), jnp.float32)

    # TODO(synk): BatchNorm is folded in eval/inference mode only (running stats);
    # training-mode batch statistics are not implemented.
    params = make_params(k_params, C)
    w_packed, b_packed = pack_params(params, C)

    ew = _default_elementwise_dtype()
    out = bidirectional_trans_fusion(point_features, trans_features,
                                     w_packed, b_packed, elementwise_dtype=ew)
    out = jax.block_until_ready(out)

    ref = ref_forward(point_features, trans_features, params,
                      elementwise_dtype=ew, out_dtype=out.dtype)
    assert out.shape == (B, 2 * C, N)
    err = float(jnp.max(jnp.abs(out.astype(jnp.float32) - ref.astype(jnp.float32))))
    assert jnp.allclose(out.astype(jnp.float32), ref.astype(jnp.float32),
                        atol=5e-2, rtol=2e-2), err

    print("KERNEL_OK")
</pallas_src>

<mosaic_0001>
module attributes {stable_mosaic.version = 11 : i64} {
  func.func @fusion_kernel(%arg0: i32, %arg1: i32, %arg2: memref<1x32x256xf32, #tpu.memory_space<vmem>>, %arg3: memref<1x32x256xf32, #tpu.memory_space<vmem>>, %arg4: memref<3x64x64xbf16, #tpu.memory_space<vmem>>, %arg5: memref<3x64x1xf32, #tpu.memory_space<vmem>>, %arg6: memref<1x64x256xbf16, #tpu.memory_space<vmem>>) attributes {dimension_semantics = [#tpu.dimension_semantics<parallel>, #tpu.dimension_semantics<parallel>], iteration_bounds = array<i64: 2, 1>, scalar_prefetch = 0 : i64, scratch_operands = 0 : i64, tpu.core_type = #tpu.core_type<tc>, window_params = [{transform_indices = @transform_0, window_bounds = array<i64: 1, 32, 256>}, {transform_indices = @transform_1, window_bounds = array<i64: 1, 32, 256>}, {pipeline_mode = #tpu.pipeline_mode<synchronous>, transform_indices = @transform_2, window_bounds = array<i64: 3, 64, 64>}, {pipeline_mode = #tpu.pipeline_mode<synchronous>, transform_indices = @transform_3, window_bounds = array<i64: 3, 64, 1>}, {transform_indices = @transform_4, window_bounds = array<i64: 1, 64, 256>}]} {
    %c0 = arith.constant 0 : index
    %c0_0 = arith.constant 0 : index
    %c0_1 = arith.constant 0 : index
    %0 = vector.load %arg2[%c0, %c0_0, %c0_1] : memref<1x32x256xf32, #tpu.memory_space<vmem>>, vector<1x32x256xf32>
    %1 = vector.shape_cast %0 : vector<1x32x256xf32> to vector<32x256xf32>
    %2 = arith.truncf %1 : vector<32x256xf32> to vector<32x256xbf16>
    %c0_2 = arith.constant 0 : index
    %c0_3 = arith.constant 0 : index
    %c0_4 = arith.constant 0 : index
    %3 = vector.load %arg3[%c0_2, %c0_3, %c0_4] : memref<1x32x256xf32, #tpu.memory_space<vmem>>, vector<1x32x256xf32>
    %4 = vector.shape_cast %3 : vector<1x32x256xf32> to vector<32x256xf32>
    %5 = arith.truncf %4 : vector<32x256xf32> to vector<32x256xbf16>
    %c0_5 = arith.constant 0 : index
    %c0_6 = arith.constant 0 : index
    %c0_7 = arith.constant 0 : index
    %6 = vector.load %arg4[%c0_5, %c0_6, %c0_7] : memref<3x64x64xbf16, #tpu.memory_space<vmem>>, vector<1x64x64xbf16>
    %7 = vector.shape_cast %6 : vector<1x64x64xbf16> to vector<64x64xbf16>
    %8 = vector.extract_strided_slice %7 {offsets = [0, 0], sizes = [64, 32], strides = [1, 1]} : vector<64x64xbf16> to vector<64x32xbf16>
    %cst = arith.constant dense<0.000000e+00> : vector<64x256xf32>
    %9 = tpu.matmul %8, %2, %cst {dimension_numbers = #tpu.dot_dimension_numbers<[1], [0], [0], [1], [0, 0, 1, 1], [], []>} : vector<64x32xbf16>, vector<32x256xbf16>, vector<64x256xf32> -> vector<64x256xf32>
    %10 = vector.extract_strided_slice %7 {offsets = [0, 32], sizes = [64, 32], strides = [1, 1]} : vector<64x64xbf16> to vector<64x32xbf16>
    %cst_8 = arith.constant dense<0.000000e+00> : vector<64x256xf32>
    %11 = tpu.matmul %10, %5, %cst_8 {dimension_numbers = #tpu.dot_dimension_numbers<[1], [0], [0], [1], [0, 0, 1, 1], [], []>} : vector<64x32xbf16>, vector<32x256xbf16>, vector<64x256xf32> -> vector<64x256xf32>
    %12 = arith.addf %9, %11 : vector<64x256xf32>
    %c0_9 = arith.constant 0 : index
    %c0_10 = arith.constant 0 : index
    %c0_11 = arith.constant 0 : index
    %13 = vector.load %arg5[%c0_9, %c0_10, %c0_11] : memref<3x64x1xf32, #tpu.memory_space<vmem>>, vector<1x64x1xf32>
    %14 = vector.shape_cast %13 : vector<1x64x1xf32> to vector<64x1xf32>
    %15 = vector.broadcast %14 : vector<64x1xf32> to vector<64x256xf32>
    %16 = arith.addf %12, %15 : vector<64x256xf32>
    %cst_12 = arith.constant 0.000000e+00 : f32
    %17 = vector.broadcast %cst_12 : f32 to vector<64x256xf32>
    %18 = arith.maximumf %16, %17 : vector<64x256xf32>
    %19 = arith.truncf %18 : vector<64x256xf32> to vector<64x256xbf16>
    %c1 = arith.constant 1 : index
    %c0_13 = arith.constant 0 : index
    %c0_14 = arith.constant 0 : index
    %20 = vector.load %arg4[%c1, %c0_13, %c0_14] : memref<3x64x64xbf16, #tpu.memory_space<vmem>>, vector<1x64x64xbf16>
    %21 = vector.shape_cast %20 : vector<1x64x64xbf16> to vector<64x64xbf16>
    %cst_15 = arith.constant dense<0.000000e+00> : vector<64x256xf32>
    %22 = tpu.matmul %21, %19, %cst_15 {dimension_numbers = #tpu.dot_dimension_numbers<[1], [0], [0], [1], [0, 0, 1, 1], [], []>} : vector<64x64xbf16>, vector<64x256xbf16>, vector<64x256xf32> -> vector<64x256xf32>
    %c1_16 = arith.constant 1 : index
    %c0_17 = arith.constant 0 : index
    %c0_18 = arith.constant 0 : index
    %23 = vector.load %arg5[%c1_16, %c0_17, %c0_18] : memref<3x64x1xf32, #tpu.memory_space<vmem>>, vector<1x64x1xf32>
    %24 = vector.shape_cast %23 : vector<1x64x1xf32> to vector<64x1xf32>
    %25 = vector.broadcast %24 : vector<64x1xf32> to vector<64x256xf32>
    %26 = arith.addf %22, %25 : vector<64x256xf32>
    %cst_19 = arith.constant 0.000000e+00 : f32
    %27 = vector.broadcast %cst_19 : f32 to vector<64x256xf32>
    %28 = arith.maximumf %26, %27 : vector<64x256xf32>
    %29 = arith.truncf %28 : vector<64x256xf32> to vector<64x256xbf16>
    %30 = arith.negf %29 : vector<64x256xbf16>
    %31 = math.exp %30 : vector<64x256xbf16>
    %cst_20 = arith.constant 1.000000e+00 : bf16
    %32 = vector.broadcast %cst_20 : bf16 to vector<64x256xbf16>
    %33 = arith.addf %32, %31 : vector<64x256xbf16>
    %34 = arith.divf %32, %33 : vector<64x256xbf16>
    %c2 = arith.constant 2 : index
    %c0_21 = arith.constant 0 : index
    %c0_22 = arith.constant 0 : index
    %35 = vector.load %arg4[%c2, %c0_21, %c0_22] : memref<3x64x64xbf16, #tpu.memory_space<vmem>>, vector<1x64x64xbf16>
    %36 = vector.shape_cast %35 : vector<1x64x64xbf16> to vector<64x64xbf16>
    %cst_23 = arith.constant dense<0.000000e+00> : vector<64x256xf32>
    %37 = tpu.matmul %36, %19, %cst_23 {dimension_numbers = #tpu.dot_dimension_numbers<[1], [0], [0], [1], [0, 0, 1, 1], [], []>} : vector<64x64xbf16>, vector<64x256xbf16>, vector<64x256xf32> -> vector<64x256xf32>
    %c2_24 = arith.constant 2 : index
    %c0_25 = arith.constant 0 : index
    %c0_26 = arith.constant 0 : index
    %38 = vector.load %arg5[%c2_24, %c0_25, %c0_26] : memref<3x64x1xf32, #tpu.memory_space<vmem>>, vector<1x64x1xf32>
    %39 = vector.shape_cast %38 : vector<1x64x1xf32> to vector<64x1xf32>
    %40 = vector.broadcast %39 : vector<64x1xf32> to vector<64x256xf32>
    %41 = arith.addf %37, %40 : vector<64x256xf32>
    %42 = arith.truncf %41 : vector<64x256xf32> to vector<64x256xbf16>
    %43 = arith.mulf %34, %42 : vector<64x256xbf16>
    %44 = arith.addf %19, %43 : vector<64x256xbf16>
    %cst_27 = arith.constant 0.000000e+00 : bf16
    %45 = vector.broadcast %cst_27 : bf16 to vector<64x256xbf16>
    %46 = arith.maximumf %44, %45 : vector<64x256xbf16>
    %c0_28 = arith.constant 0 : index
    %c0_29 = arith.constant 0 : index
    %c0_30 = arith.constant 0 : index
    %47 = vector.load %arg6[%c0_28, %c0_29, %c0_30] : memref<1x64x256xbf16, #tpu.memory_space<vmem>>, vector<1x64x256xbf16>
    %48 = vector.shape_cast %47 : vector<1x64x256xbf16> to vector<64x256xbf16>
    %49 = vector.shape_cast %46 : vector<64x256xbf16> to vector<1x64x256xbf16>
    tpu.vector_store %arg6[%c0_28, %c0_29, %c0_30], %49 {strides = array<i32>} : memref<1x64x256xbf16, #tpu.memory_space<vmem>>, vector<1x64x256xbf16>,
    return
  }
  func.func @transform_0(%arg0: i32, %arg1: i32) -> (i32, i32, i32) {
    %c0_i32 = arith.constant 0 : i32
    %c0_i32_0 = arith.constant 0 : i32
    return %arg0, %c0_i32, %arg1 : i32, i32, i32
  }
  func.func @transform_1(%arg0: i32, %arg1: i32) -> (i32, i32, i32) {
    %c0_i32 = arith.constant 0 : i32
    %c0_i32_0 = arith.constant 0 : i32
    return %arg0, %c0_i32, %arg1 : i32, i32, i32
  }
  func.func @transform_2(%arg0: i32, %arg1: i32) -> (i32, i32, i32) {
    %c0_i32 = arith.constant 0 : i32
    %c0_i32_0 = arith.constant 0 : i32
    %c0_i32_1 = arith.constant 0 : i32
    %c0_i32_2 = arith.constant 0 : i32
    return %c0_i32, %c0_i32_0, %c0_i32_1 : i32, i32, i32
  }
  func.func @transform_3(%arg0: i32, %arg1: i32) -> (i32, i32, i32) {
    %c0_i32 = arith.constant 0 : i32
    %c0_i32_0 = arith.constant 0 : i32
    %c0_i32_1 = arith.constant 0 : i32
    %c0_i32_2 = arith.constant 0 : i32
    return %c0_i32, %c0_i32_0, %c0_i32_1 : i32, i32, i32
  }
  func.func @transform_4(%arg0: i32, %arg1: i32) -> (i32, i32, i32) {
    %c0_i32 = arith.constant 0 : i32
    %c0_i32_0 = arith.constant 0 : i32
    return %arg0, %c0_i32, %arg1 : i32, i32, i32
  }
}

</mosaic_0001>

<bundles_post_ra>
// kernel: tpu_custom_call.1
= control target key start
LH: loop header
LB: loop body
LE: loop exit
PB: predicated region body
PF: predicated region fallthrough
CT: control target
= control target key end

     0   :  { %9 = vsyncpa [#allocation3], 0  ;;  %s2062_s0 = inlined_call_operand.vmem [shape: f32[2,32,256], index: 0, kind: input, shape index: {}]   ;;  %s2063_s1 = inlined_call_operand.hbm [shape: f32[2,32,256], index: 1, kind: input, shape index: {}]   ;;  %s2064_s2 = inlined_call_operand.hbm [shape: bf16[3,64,64], index: 2, kind: input, shape index: {}]   ;;  %s2065_s3 = inlined_call_operand.vmem [shape: f32[3,64,1], index: 3, kind: input, shape index: {}]   ;;  %s2066_s4 = inlined_call_operand.hbm [shape: bf16[2,64,256], index: 4, kind: output, shape index: {}]  }
   0x1   :  { %11 = vsyncpa [#allocation3 + $0x1], 0 }
   0x2   :  { %12 = vsyncpa [#allocation6], 0 }
   0x3   :  { %13 = vsyncpa [#allocation4], 0 }
   0x4   :  { %15 = vsyncpa [#allocation4 + $0x1], 0  ;;  %s1633_s15 = smov 0   ;;  %s1635_s16 = smov 0  }
   0x5   :  { %s1637_s17 = smov 0   ;;  %s1639_s18 = smov 0  }
   0x6   :  { %s1641_s19 = smov 0   ;;  %s1643_s20 = smov 0  }
   0x7 LB: > { %s1226_s21 = sadd.s32 4294967295, %s1595_s20   ;;  %s1227_s22 = sadd.s32 4294967294, %s1595_s20   ;;  %s1595_s20 = sphi %s1643_s20, %s21_s20   ;;  %s1591_s19 = sphi %s1641_s19, %s2090_s19   ;;  %s1587_s18 = sphi %s1639_s18, %s2089_s18   ;;  %s1583_s17 = sphi %s1637_s17, %s2088_s17   ;;  %s1579_s16 = sphi %s1635_s16, %s2087_s16   ;;  %s1575_s15 = sphi %s1633_s15, %s2086_s15  }
   0x8   : > { %p83_p0 = scmp.ne.s32.totalorder %s1579_s16, %s1575_s15  ;;  %p1667_p1 = scmp.eq.s32.totalorder %s1226_s21, 0 }
   0x9   : > { %p1671_p2 = scmp.eq.s32.totalorder %s1226_s21, 1  ;;  %p157_p3 = scmp.eq.s32.totalorder %s1227_s22, 1 }
   0xa   : > { %s2071_s23 = scalar_select %p1667_p1, 1, 0 }
   0xb   : > { %s2072_s24 = scalar_select %p1671_p2, 1, 0 }
   0xc   : > { %p1677_p4 = por %p1667_p1, %p83_p0  ;;  %p1228_p5 = scmp.ge.s32.totalorder %s1595_s20, 1 }
   0xd   : > { %p1682_p6 = por %p157_p3, %p83_p0  ;;  %p164_p7 = scmp.lt.s32.totalorder %s1595_s20, 3 }
   0xe   : > { %s2073_s25 = scalar_select %p1677_p4, 1, 0 }
   0xf   : > { %s2074_s26 = scalar_select %p1682_p6, 1, 0 }
  0x10   : > { %p1687_p8 = pnand %p1228_p5, %p164_p7  ;;  %s1597_s28 = smov [#allocation5]  }
  0x11   : > { %s176_s29 = sshll.u32 %s1597_s28, 4  ;;  %s33_s5 = sadd.s32 1, %s1591_s19  ;;  %s177_s29 = int_to_ptr.vmem [resolvable:$true] %s176_s29 }
  0x12   : > { %s2075_s27 = scalar_select %p1687_p8, 1, 0 }
  0x13   : > { %p1332_p9 = pneg %p1687_p8  ;;  %s1451_s8 = scalar_lea.hbm %s2064_s2, 1536 }
  0x14   : > { %p1452_p12 = scmp.ne.s32.totalorder %s2064_s2, %s1451_s8  ;;  %p1458_p5 = scmp.lt.u32.totalorder %s1451_s8, %s2064_s2 }
  0x15   : > { %p1696_p11 = pnand %p1332_p9, %p1667_p1 }
  0x17   : > { %p1453_p13 = pneg %p1696_p11 }
  0x19   : > { %p1454_p0 = pnand %p1453_p13, %p1452_p12 }
  0x1b   : > { %p1455_p3 = pneg %p1454_p0 }
  0x1d   : > { %p1460_p7 = pnand %p1458_p5, %p1455_p3 }
  0x1f   : > { %1463 = shalt.err (!%p1460_p7)
}
  0x20   : > { %s1464_s13 = scalar_lea.vmem %s177_s29, 1536  ;;  %p1472_p1 = scmp.lt.s32.totalorder %s177_s29, %s177_s29 }
  0x21   : > { %p1465_p9 = scmp.ne.s32.totalorder %s177_s29, %s1464_s13  ;;  %p1473_p4 = scmp.lt.s32.totalorder %s1464_s13, %s1464_s13 }
  0x23   : > { %p1467_p10 = pnand %p1465_p9, %p1453_p13  ;;  %p1474_p8 = por %p1473_p4, %p1472_p1 }
  0x25   : > { %p1468_p6 = pneg %p1467_p10 }
  0x27   : > { %p1475_p2 = pnand %p1474_p8, %p1468_p6 }
  0x29   : > { %1478 = shalt.err (!%p1475_p2)
}
  0x2a   : > { %s1598_s14 = smov 64   ;;  %s1599_s21 = smov 4  }
  0x2b   : > { %1335 = dma.hbm_to_vmem [thread:$0]  (!%p1696_p11), %s2064_s2, 1536, %s177_s29, [#allocation6], %s1598_s14, %s1598_s14, %s1599_s21  }
  0x2c   : > { %p35_p1 = scmp.ge.s32.totalorder %s33_s5, 2  ;;  %s70_s6 = sadd.s32 1, %s1583_s17 }
  0x2d   : > { %p77_p2 = scmp.ne.s32.totalorder %s1583_s17, %s1579_s16  ;;  %p78_p4 = scmp.eq.s32.totalorder %s1595_s20, 0 }
  0x2e   : > { %s2092_s5 = smov (%p35_p1, %s33_s5), 0  ;;  %p2078_p8 = scmp.ne.s32.totalorder %s2072_s24, 0 }
  0x2f   : > { %p1723_p6 = por %p78_p4, %p77_p2  ;;  %s65_s30 = ssub.s32 %s1591_s19, %s2092_s5 }
  0x30   : > { %p1729_p10 = por %p2078_p8, %p77_p2  ;;  %p1345_p12 = scmp.lt.s32.totalorder %s1595_s20, 2 }
  0x31   : > { %p68_p11 = scmp.eq.s32.totalorder %s65_s30, 0  ;;  %s206_s29 = sand.u32 1, %s1583_s17  }
  0x32   : > { %s1231_s9 = sshll.u32 %s206_s29, 6  ;;  %s1305_s11 = sshll.u32 %s1591_s19, 10 }
  0x33   : > { %s1738_s10 = scalar_select %p68_p11, %s1583_s17, %s70_s6  }
  0x34   : > { %s1744_s14 = scalar_lea.hbm %s2063_s1, %s1305_s11  ;;  %s210_s24 = scalar_lea.vmem [#allocation2], %s1231_s9 }
  0x35   : > { %s219_s21 = sshll.u32 %s210_s24, 4  ;;  %p1750_p13 = pnand %p1345_p12, %p1723_p6  ;;  %s1746_s21 = int_to_ptr.vmem [resolvable:$true] %s219_s21 }
  0x36   : > { %s1754_s28 = scalar_lea.sflag [#allocation3], %s206_s29  ;;  %s1479_s6 = scalar_lea.hbm %s1744_s14, 1024 }
  0x37   : > { %p1480_p0 = scmp.ne.s32.totalorder %s1744_s14, %s1479_s6  ;;  %p1481_p3 = pneg %p1750_p13 }
  0x38   : > { %s1484_s7 = scalar_lea.hbm %s2063_s1, 2048  ;;  %p1485_p9 = scmp.lt.u32.totalorder %s1744_s14, %s2063_s1 }
  0x39   : > { %p1482_p5 = pnand %p1481_p3, %p1480_p0  ;;  %p1486_p1 = scmp.lt.u32.totalorder %s1484_s7, %s1479_s6 }
  0x3a   : > { %p1488_p4 = scmp.lt.u32.totalorder %s1479_s6, %s1744_s14 }
  0x3b   : > { %p1483_p7 = pneg %p1482_p5  ;;  %p1487_p2 = por %p1486_p1, %p1485_p9 }
  0x3d   : > { %p1489_p6 = por %p1488_p4, %p1487_p2 }
  0x3f   : > { %p1490_p8 = pnand %p1489_p6, %p1483_p7 }
  0x41   : > { %1493 = shalt.err (!%p1490_p8)
}
  0x42   : > { %s1494_s29 = scalar_lea.vmem %s1746_s21, 1024  ;;  %s1600_s13 = smov [#allocation2]  }
  0x43   : > { %p1495_p12 = scmp.ne.s32.totalorder %s1746_s21, %s1494_s29  ;;  %s1499_s24 = sshll.u32 %s1600_s13, 4  ;;  %s1500_s24 = int_to_ptr.vmem [resolvable:$false] %s1499_s24 }
  0x44   : > { %s1501_s30 = scalar_lea.vmem %s1500_s24, 2048  ;;  %p1502_p5 = scmp.lt.s32.totalorder %s1746_s21, %s1500_s24 }
  0x45   : > { %p1497_p11 = pnand %p1495_p12, %p1481_p3  ;;  %p1503_p9 = scmp.lt.s32.totalorder %s1501_s30, %s1494_s29 }
  0x47   : > { %p1498_p0 = pneg %p1497_p11  ;;  %p1504_p1 = por %p1503_p9, %p1502_p5 }
  0x49   : > { %p1505_p2 = pnand %p1504_p1, %p1498_p0 }
  0x4b   : > { %1508 = shalt.err (!%p1505_p2)
}
  0x4c   : > { %s1601_s6 = smov 256   ;;  %s1602_s9 = smov 16  }
  0x4d   : > { %1339 = dma.hbm_to_vmem [thread:$0]  (!%p1750_p13), %s1744_s14, 1024, %s1746_s21, %s1754_s28, %s1601_s6, %s1601_s6, %s1602_s9  }
  0x4e   : > { %p2081_p3 = scmp.ne.s32.totalorder %s2075_s27, 0 }
  0x4f   : > { %s1785_s7 = sand.u32 (!%p2081_p3), 1, %s1579_s16   ;;  %p2082_p7 = scmp.ne.s32.totalorder (!%p2081_p3), %s2073_s25, 0 }
  0x50   : > { %231 = sbr.rel (%p2081_p3) target bundleno = 788 (0x314), region = 36  ;;  %s1235_s11 = sshll.u32 (!%p2081_p3), %s1785_s7, 6 }
  0x51   : > { %s234_s12 = scalar_lea.sflag (!%p2081_p3), [#allocation3], %s1785_s7  ;;  %s1791_s29 = scalar_lea.vmem (!%p2081_p3), [#allocation2], %s1235_s11 }
  0x57   : > { %1562 = dma.done.wait (%p2082_p7), %s234_s12, 1024  }
  0x58   : > { %1564 = vsyncadd (%p2082_p7), %s234_s12, 4294966272  ;;  %p2083_p13 = scmp.ne.s32.totalorder %s2071_s23, 0 }
  0x5a   : > { %1566 = dma.done.wait (%p2083_p13), [#allocation6], 1536  }
  0x5b   : > { %1568 = vsyncadd (%p2083_p13), [#allocation6], 4294965760  ;;  %p276_p4 = scmp.lt.s32.totalorder %s1587_s18, 1  ;;  %v1603_v0 = vmov 0   ;;  %v1807_v1 = vld [vmem:[#allocation5] sm:$0xff]   ;;  %v1809_v2 = vld [vmem:[#allocation5 + $0x8] sm:$0xff]  }
  0x5c   : > { %394 = vmatprep.mubr.bf16.mxu0 %v1603_v0  ;;  %1406 = vset.pattern.permute.xlu1 %v1603_v0  ;;  %s1604_s27 = smov 96   ;;  %v1812_v3 = vld [vmem:[#allocation5 + $0x10] sm:$0xff]   ;;  %v1814_v4 = vld [vmem:[#allocation5 + $0x18] sm:$0xff]   ;;  %v302_v5 = vld [vmem:[%s1791_s29 + $0x8] sm:$0xff]  ;;  %vm349_vm0 = vcmask 261120   ;;  %vm686_vm1 = vcmask 523264  }
  0x5d   : > { %1405 = vset.pattern.permute.xlu0 %v1603_v0  ;;  %731 = vmatprep.mubr.bf16.mxu1 %v1603_v0  ;;  %s277_s25 = scalar_select %p276_p4, %s1587_s18, 1  ;;  %v304_v6 = vld [vmem:[%s1791_s29 + $0x18] sm:$0xff]  ;;  %v301_v7 = vld [vmem:[%s1791_s29] sm:$0xff]  ;;  %v303_v9 = vld [vmem:[%s1791_s29 + $0x10] sm:$0xff] }
  0x5e   : > { %341 = vrot.lane.b32.xlu0 %v1807_v1, %s1604_s27  ;;  %345 = vrot.lane.b32.xlu1 %v1812_v3, %s1604_s27  ;;  %v310_v8 = vpack.c.bf16 %v304_v6, %v302_v5  ;;  %v306_v10 = vld [vmem:[%s1791_s29 + $0x28] sm:$0xff]  ;;  %v308_v11 = vld [vmem:[%s1791_s29 + $0x38] sm:$0xff]  ;;  %v309_v12 = vpack.c.bf16 %v303_v9, %v301_v7  ;;  %s1605_s13 = smov [#allocation7]  }
  0x5f   : > { %s1306_s23 = sshll.u32 %s277_s25, 6  ;;  %v312_v13 = vpack.c.bf16 %v308_v11, %v306_v10  ;;  %v305_v14 = vld [vmem:[%s1791_s29 + $0x20] sm:$0xff]  ;;  %v307_v15 = vld [vmem:[%s1791_s29 + $0x30] sm:$0xff]  ;;  %v521_v20 = vld [vmem:[%s2065_s3 + $0x8] sm:$0xff]  ;;  %s1513_s24 = sshll.u32 %s1605_s13, 4  ;;  %s1514_s24 = int_to_ptr.vmem [resolvable:$false] %s1513_s24 }
  0x60   : > { %s1819_s22 = scalar_lea.vmem %s2062_s0, %s1306_s23  ;;  %362 = vmatprep.subr.bf16.mxu0 %v310_v8  ;;  %v311_v18 = vpack.c.bf16 %v307_v15, %v305_v14  ;;  %v520_v21 = vld [vmem:[%s2065_s3] sm:$0xff]  ;;  %v522_v22 = vld [vmem:[%s2065_s3 + $0x10] sm:$0xff]  ;;  %v523_v23 = vld [vmem:[%s2065_s3 + $0x18] sm:$0xff]  ;;  %s1515_s30 = scalar_lea.vmem %s1514_s24, 2048 }
  0x61   : > { %v290_v16 = vld [vmem:[%s1819_s22 + $0x8] sm:$0xff]  ;;  %v292_v17 = vld [vmem:[%s1819_s22 + $0x18] sm:$0xff]  ;;  %363 = vmatpush1.bf16.msra.mxu0 %v309_v12  ;;  %v524_v24 = vld [vmem:[%s2065_s3 + $0x20] sm:$0xff] }
  0x62   : > { %343 = vrot.lane.b32.xlu0 %v1809_v2, %s1604_s27  ;;  %347 = vrot.lane.b32.xlu1 %v1814_v4, %s1604_s27  ;;  %v298_v19 = vpack.c.bf16 %v292_v17, %v290_v16  ;;  %v525_v25 = vld [vmem:[%s2065_s3 + $0x28] sm:$0xff]  ;;  %v526_v26 = vld [vmem:[%s2065_s3 + $0x30] sm:$0xff] }
  0x63   : > { %364 = vmatprep.subr.bf16.mxu0 %v312_v13  ;;  %v527_v27 = vld [vmem:[%s2065_s3 + $0x38] sm:$0xff]  ;;  %v1252_v28 = vld [vmem:[%s2065_s3 + $0x40] sm:$0xff]  ;;  %v1253_v29 = vld [vmem:[%s2065_s3 + $0x48] sm:$0xff] }
  0x64   : > { %v1254_v30 = vld [vmem:[%s2065_s3 + $0x50] sm:$0xff]  ;;  %v1255_v31 = vld [vmem:[%s2065_s3 + $0x58] sm:$0xff]  ;;  %v1256_v32 = vld [vmem:[%s2065_s3 + $0x60] sm:$0xff] }
  0x65   : > { %365 = vmatpush1.bf16.msra.mxu0 %v311_v18  ;;  %v1257_v33 = vld [vmem:[%s2065_s3 + $0x68] sm:$0xff]  ;;  %v1258_v34 = vld [vmem:[%s2065_s3 + $0x70] sm:$0xff]  ;;  %v1259_v35 = vld [vmem:[%s2065_s3 + $0x78] sm:$0xff] }
  0x66   : > { %447 = vmatprep.subr.bf16.mxu0 %v298_v19  ;;  %535 = vperm.xlu1 %1406, %v521_v20   ;;  %v1276_v36 = vld [vmem:[%s2065_s3 + $0x80] sm:$0xff]  ;;  %v1277_v37 = vld [vmem:[%s2065_s3 + $0x88] sm:$0xff]  ;;  %v1278_v38 = vld [vmem:[%s2065_s3 + $0x90] sm:$0xff] }
  0x67   : > { %530 = vperm.xlu0 %1405, %v520_v21   ;;  %v1279_v39 = vld [vmem:[%s2065_s3 + $0x98] sm:$0xff]  ;;  %v1280_v40 = vld [vmem:[%s2065_s3 + $0xa0] sm:$0xff]  ;;  %v1281_v41 = vld [vmem:[%s2065_s3 + $0xa8] sm:$0xff] }
  0x68   : > { %v1282_v42 = vld [vmem:[%s2065_s3 + $0xb0] sm:$0xff]  ;;  %v1283_v43 = vld [vmem:[%s2065_s3 + $0xb8] sm:$0xff]  ;;  %v289_v44 = vld [vmem:[%s1819_s22] sm:$0xff] }
  0x69   : > { %v291_v45 = vld [vmem:[%s1819_s22 + $0x10] sm:$0xff]  ;;  %v294_v46 = vld [vmem:[%s1819_s22 + $0x28] sm:$0xff]  ;;  %v296_v47 = vld [vmem:[%s1819_s22 + $0x38] sm:$0xff] }
  0x6a   : > { %540 = vperm.xlu1 %1406, %v522_v22   ;;  %v297_v48 = vpack.c.bf16 %v291_v45, %v289_v44  ;;  %v300_v49 = vpack.c.bf16 %v296_v47, %v294_v46  ;;  %v293_v50 = vld [vmem:[%s1819_s22 + $0x20] sm:$0xff]  ;;  %v295_v51 = vld [vmem:[%s1819_s22 + $0x30] sm:$0xff]  ;;  %s1984_s22 = scalar_lea.vmem [#allocation7], %s1235_s11  ;;  %s1307_s11 = sshll.u32 %s1587_s18, 10 }
  0x6b   : > { %545 = vperm.xlu0 %1405, %v523_v23   ;;  %v299_v53 = vpack.c.bf16 %v295_v51, %v293_v50  ;;  %s1111_s23 = sshll.u32 %s1984_s22, 4  ;;  %s2009_s21 = scalar_lea.hbm %s2066_s4, %s1307_s11  ;;  %s2011_s23 = int_to_ptr.vmem [resolvable:$true] %s1111_s23 }
  0x6c   : > { %s1096_s18 = scalar_lea.sflag [#allocation4], %s1785_s7  ;;  %s1509_s28 = scalar_lea.vmem %s2011_s23, 1024 }
  0x6d   : > { %p1510_p6 = scmp.ne.s32.totalorder %s2011_s23, %s1509_s28  ;;  %p1516_p11 = scmp.lt.s32.totalorder %s2011_s23, %s1514_s24 }
  0x6e   : > { %550 = vperm.xlu1 %1406, %v524_v24   ;;  %p1517_p0 = scmp.lt.s32.totalorder %s1515_s30, %s1509_s28 }
  0x6f   : > { %555 = vperm.xlu0 %1405, %v525_v25   ;;  %p1511_p8 = pnand %p1510_p6, %p1729_p10 }
  0x70   : > { %p1518_p5 = por %p1517_p0, %p1516_p11 }
  0x71   : > { %p1512_p12 = pneg %p1511_p8 }
  0x72   : > { %560 = vperm.xlu1 %1406, %v526_v26  }
  0x73   : > { %565 = vperm.xlu0 %1405, %v527_v27   ;;  %p1519_p9 = pnand %p1518_p5, %p1512_p12 }
  0x76   : > { %628 = vperm.xlu1 %1406, %v1252_v28  }
  0x77   : > { %633 = vperm.xlu0 %1405, %v1253_v29  }
  0x7a   : > { %638 = vperm.xlu1 %1406, %v1254_v30  }
  0x7b   : > { %643 = vperm.xlu0 %1405, %v1255_v31  }
  0x7e   : > { %648 = vperm.xlu1 %1406, %v1256_v32  }
  0x7f   : > { %653 = vperm.xlu0 %1405, %v1257_v33  }
  0x82   : > { %658 = vperm.xlu1 %1406, %v1258_v34  }
  0x83   : > { %663 = vperm.xlu0 %1405, %v1259_v35  }
  0x86   : > { %872 = vperm.xlu1 %1406, %v1276_v36  }
  0x87   : > { %877 = vperm.xlu0 %1405, %v1277_v37  }
  0x8a   : > { %882 = vperm.xlu1 %1406, %v1278_v38  }
  0x8b   : > { %887 = vperm.xlu0 %1405, %v1279_v39  }
  0x8e   : > { %892 = vperm.xlu1 %1406, %v1280_v40  }
  0x8f   : > { %897 = vperm.xlu0 %1405, %v1281_v41  }
  0x92   : > { %902 = vperm.xlu1 %1406, %v1282_v42  }
  0x93   : > { %907 = vperm.xlu0 %1405, %v1283_v43  }
  0xd0   : > { %v342_v52 = vpop.permute.xlu0 %341  ;;  %v346_v55 = vpop.permute.xlu1 %345 }
  0xd1   : > { %1244 = vmatmul.mubr.msk.bf16.vlgmr.msra.gmra.mrb[0].mxu0 %vm349_vm0, %v342_v52 }
  0xd2   : > { %448 = vmatpush1.bf16.msra.mxu0 %v297_v48  ;;  %404 = vmatprep.mubr.bf16.mxu0 %v1603_v0 }
  0xd3   : > { %449 = vmatprep.subr.bf16.mxu0 %v300_v49 }
  0xd4   : > { %v344_v54 = vpop.permute.xlu0 %343  ;;  %v348_v56 = vpop.permute.xlu1 %347 }
  0xd6   : > { %450 = vmatpush1.bf16.msra.mxu0 %v299_v53 }
  0xd9   : > { %1245 = vmatmul.mubr.msk.bf16.gmra.mrb[4].mxu0 %vm349_vm0, %v344_v54 }
  0xda   : > { %414 = vmatprep.mubr.bf16.mxu0 %v1603_v0 }
  0xe1   : > { %1246 = vmatmul.mubr.msk.bf16.gmra.mrb[8].mxu0 %vm349_vm0, %v346_v55 }
  0xe2   : > { %424 = vmatprep.mubr.bf16.mxu0 %v1603_v0 }
  0xe5   : > { %v536_v61 = vpop.permute.xlu1 %535 }
  0xe6   : > { %v531_v57 = vpop.permute.xlu0 %530 }
  0xe9   : > { %1247 = vmatmul.mubr.msk.bf16.gmra.mrb[12].mxu0 %vm349_vm0, %v348_v56  ;;  %v541_v10 = vpop.permute.xlu1 %540 }
  0xea   : > { %479 = vmatprep.mubr.bf16.mxu0 %v1603_v0  ;;  %v546_v14 = vpop.permute.xlu0 %545 }
  0xed   : > { %v551_v25 = vpop.permute.xlu1 %550 }
  0xee   : > { %v556_v30 = vpop.permute.xlu0 %555 }
  0xf1   : > { %1248 = vmatmul.mubr.msk.bf16.vlgmr.msra.gmra.mrb[0].mxu0 %vm349_vm0, %v1807_v1  ;;  %v561_v41 = vpop.permute.xlu1 %560 }
  0xf2   : > { %489 = vmatprep.mubr.bf16.mxu0 %v1603_v0  ;;  %v566_v46 = vpop.permute.xlu0 %565 }
  0xf9   : > { %1249 = vmatmul.mubr.msk.bf16.gmra.mrb[4].mxu0 %vm349_vm0, %v1809_v2 }
  0xfa   : > { %499 = vmatprep.mubr.bf16.mxu0 %v1603_v0 }
 0x101   : > { %1250 = vmatmul.mubr.msk.bf16.gmra.mrb[8].mxu0 %vm349_vm0, %v1812_v3 }
 0x102   : > { %509 = vmatprep.mubr.bf16.mxu0 %v1603_v0 }
 0x109   : > { %1251 = vmatmul.mubr.msk.bf16.gmra.mrb[12].mxu0 %vm349_vm0, %v1814_v4 }
 0x1c4   : > { %v481_v58 = vpop.f32.mrb[0].mxu0 }
 0x1c5   : > { %v568_v59 = vadd.f32 %v531_v57, %v481_v58  ;;  %v483_v60 = vpop.f32.mrb[1].mxu0  ;;  %v1411_v58 = vld [vmem:[#allocation5 + $0x20] sm:$0xff]  }
 0x1c6   : > { %v569_v62 = vadd.f32 %v531_v57, %v483_v60  ;;  %v485_v63 = vpop.f32.mrb[2].mxu0  ;;  %v1413_v60 = vld [vmem:[#allocation5 + $0x30] sm:$0xff]  }
 0x1c7   : > { %v570_v1 = vadd.f32 %v536_v61, %v485_v63  ;;  %v487_v5 = vpop.f32.mrb[3].mxu0  ;;  %v584_v6 = vmax.f32 %v568_v59, 0.0  ;;  %v1412_v59 = vld [vmem:[#allocation5 + $0x28] sm:$0xff]  }
 0x1c8   : > { %v571_v2 = vadd.f32 %v536_v61, %v487_v5  ;;  %v585_v8 = vmax.f32 %v569_v62, 0.0  ;;  %v1414_v61 = vld [vmem:[#allocation5 + $0x38] sm:$0xff]   ;;  %v1415_v62 = vld [vmem:[#allocation5 + $0x40] sm:$0xff]   ;;  %v1416_v63 = vld [vmem:[#allocation5 + $0x48] sm:$0xff]  }
 0x1c9   : > { %v586_v7 = vmax.f32 %v570_v1, 0.0  ;;  %v1417_v1 = vld [vmem:[#allocation5 + $0x50] sm:$0xff]   ;;  %v1418_v5 = vld [vmem:[#allocation5 + $0x58] sm:$0xff]  }
 0x1ca   : > { %v587_v9 = vmax.f32 %v571_v2, 0.0  ;;  %v629_v2 = vpop.permute.xlu1 %628 }
 0x1cb   : > { %v1931_v3 = vpack.c.bf16 %v586_v7, %v584_v6 }
 0x1cc   : > { %v1933_v11 = vpack.c.bf16 %v587_v9, %v585_v8  ;;  %v491_v4 = vpop.f32.mrb[4].mxu0  ;;  %v634_v9 = vpop.permute.xlu0 %633 }
 0x1cd   : > { %v572_v12 = vadd.f32 %v541_v10, %v491_v4  ;;  %v493_v13 = vpop.f32.mrb[5].mxu0 }
 0x1ce   : > { %v573_v15 = vadd.f32 %v541_v10, %v493_v13  ;;  %v495_v16 = vpop.f32.mrb[6].mxu0  ;;  %699 = vmatprep.subr.bf16.mxu1 %v1933_v11 }
 0x1cf   : > { %v574_v17 = vadd.f32 %v546_v14, %v495_v16  ;;  %v497_v18 = vpop.f32.mrb[7].mxu0  ;;  %700 = vmatpush1.bf16.msra.mxu1 %v1931_v3  ;;  %v588_v20 = vmax.f32 %v572_v12, 0.0 }
 0x1d0   : > { %v575_v19 = vadd.f32 %v546_v14, %v497_v18  ;;  %v589_v22 = vmax.f32 %v573_v15, 0.0 }
 0x1d1   : > { %v590_v21 = vmax.f32 %v574_v17, 0.0 }
 0x1d2   : > { %v591_v23 = vmax.f32 %v575_v19, 0.0 }
 0x1d3   : > { %v1937_v24 = vpack.c.bf16 %v590_v21, %v588_v20  ;;  %v639_v20 = vpop.permute.xlu1 %638 }
 0x1d4   : > { %v1939_v26 = vpack.c.bf16 %v591_v23, %v589_v22  ;;  %v501_v27 = vpop.f32.mrb[8].mxu0 }
 0x1d5   : > { %v576_v28 = vadd.f32 %v551_v25, %v501_v27  ;;  %v503_v29 = vpop.f32.mrb[9].mxu0 }
 0x1d6   : > { %v577_v31 = vadd.f32 %v551_v25, %v503_v29  ;;  %v505_v32 = vpop.f32.mrb[10].mxu0  ;;  %701 = vmatprep.subr.bf16.mxu1 %v1939_v26 }
 0x1d7   : > { %v578_v33 = vadd.f32 %v556_v30, %v505_v32  ;;  %v507_v34 = vpop.f32.mrb[11].mxu0  ;;  %702 = vmatpush1.bf16.msra.mxu1 %v1937_v24  ;;  %v592_v36 = vmax.f32 %v576_v28, 0.0  ;;  %v644_v28 = vpop.permute.xlu0 %643 }
 0x1d8   : > { %v579_v35 = vadd.f32 %v556_v30, %v507_v34  ;;  %v593_v38 = vmax.f32 %v577_v31, 0.0 }
 0x1d9   : > { %v594_v37 = vmax.f32 %v578_v33, 0.0 }
 0x1da   : > { %v595_v39 = vmax.f32 %v579_v35, 0.0 }
 0x1db   : > { %v1943_v40 = vpack.c.bf16 %v594_v37, %v592_v36 }
 0x1dc   : > { %v1945_v42 = vpack.c.bf16 %v595_v39, %v593_v38  ;;  %v511_v43 = vpop.f32.mrb[12].mxu0 }
 0x1dd   : > { %v580_v44 = vadd.f32 %v561_v41, %v511_v43  ;;  %v513_v45 = vpop.f32.mrb[13].mxu0 }
 0x1de   : > { %v581_v47 = vadd.f32 %v561_v41, %v513_v45  ;;  %v515_v48 = vpop.f32.mrb[14].mxu0  ;;  %703 = vmatprep.subr.bf16.mxu1 %v1945_v42  ;;  %v649_v41 = vpop.permute.xlu1 %648 }
 0x1df   : > { %v582_v49 = vadd.f32 %v566_v46, %v515_v48  ;;  %v517_v50 = vpop.f32.mrb[15].mxu0  ;;  %704 = vmatpush1.bf16.msra.mxu1 %v1943_v40  ;;  %v596_v52 = vmax.f32 %v580_v44, 0.0  ;;  %v654_v48 = vpop.permute.xlu0 %653 }
 0x1e0   : > { %v583_v51 = vadd.f32 %v566_v46, %v517_v50  ;;  %v597_v54 = vmax.f32 %v581_v47, 0.0 }
 0x1e1   : > { %v598_v53 = vmax.f32 %v582_v49, 0.0 }
 0x1e2   : > { %v599_v55 = vmax.f32 %v583_v51, 0.0 }
 0x1e3   : > { %v1949_v56 = vpack.c.bf16 %v598_v53, %v596_v52 }
 0x1e4   : > { %v1951_v57 = vpack.c.bf16 %v599_v55, %v597_v54 }
 0x1e6   : > { %705 = vmatprep.subr.bf16.mxu1 %v1951_v57 }
 0x1e7   : > { %706 = vmatpush1.bf16.msra.mxu1 %v1949_v56 }
 0x1e8   : > { %942 = vmatprep.subr.bf16.mxu1 %v1933_v11 }
 0x1ea   : > { %1264 = vmatmul.mubr.msk.bf16.vlgmr.msra.gmra.mrb[0].mxu1 %vm686_vm1, %v1411_v58 }
 0x1eb   : > { %943 = vmatpush1.bf16.msra.mxu1 %v1931_v3  ;;  %741 = vmatprep.mubr.bf16.mxu1 %v1603_v0 }
 0x1ec   : > { %944 = vmatprep.subr.bf16.mxu1 %v1939_v26 }
 0x1ef   : > { %945 = vmatpush1.bf16.msra.mxu1 %v1937_v24 }
 0x1f0   : > { %946 = vmatprep.subr.bf16.mxu1 %v1945_v42 }
 0x1f2   : > { %1265 = vmatmul.mubr.msk.bf16.gmra.mrb[4].mxu1 %vm686_vm1, %v1412_v59 }
 0x1f3   : > { %947 = vmatpush1.bf16.msra.mxu1 %v1943_v40  ;;  %751 = vmatprep.mubr.bf16.mxu1 %v1603_v0 }
 0x1f4   : > { %948 = vmatprep.subr.bf16.mxu1 %v1951_v57 }
 0x1f7   : > { %949 = vmatpush1.bf16.msra.mxu1 %v1949_v56 }
 0x1fa   : > { %1266 = vmatmul.mubr.msk.bf16.gmra.mrb[8].mxu1 %vm686_vm1, %v1413_v60 }
 0x1fb   : > { %761 = vmatprep.mubr.bf16.mxu1 %v1603_v0 }
 0x202   : > { %1267 = vmatmul.mubr.msk.bf16.gmra.mrb[12].mxu1 %vm686_vm1, %v1414_v61 }
 0x203   : > { %974 = vmatprep.mubr.bf16.mxu1 %v1603_v0 }
 0x20a   : > { %1288 = vmatmul.mubr.msk.bf16.vlgmr.msra.gmra.mrb[16].mxu1 %vm686_vm1, %v1415_v62 }
 0x20b   : > { %984 = vmatprep.mubr.bf16.mxu1 %v1603_v0 }
 0x212   : > { %1289 = vmatmul.mubr.msk.bf16.gmra.mrb[20].mxu1 %vm686_vm1, %v1416_v63 }
 0x213   : > { %994 = vmatprep.mubr.bf16.mxu1 %v1603_v0 }
 0x21a   : > { %1290 = vmatmul.mubr.msk.bf16.gmra.mrb[24].mxu1 %vm686_vm1, %v1417_v1 }
 0x21b   : > { %1004 = vmatprep.mubr.bf16.mxu1 %v1603_v0 }
 0x222   : > { %1291 = vmatmul.mubr.msk.bf16.gmra.mrb[28].mxu1 %vm686_vm1, %v1418_v5  ;;  %v659_v5 = vpop.permute.xlu1 %658 }
 0x2bd   : > { %v733_v6 = vpop.f32.mrb[0].mxu1 }
 0x2be   : > { %v734_v7 = vadd.f32 %v733_v6, %v629_v2  ;;  %v735_v8 = vpop.f32.mrb[1].mxu1 }
 0x2bf   : > { %v736_v10 = vadd.f32 %v735_v8, %v629_v2  ;;  %v737_v4 = vpop.f32.mrb[2].mxu1 }
 0x2c0   : > { %v738_v12 = vadd.f32 %v737_v4, %v634_v9  ;;  %v739_v13 = vpop.f32.mrb[3].mxu1  ;;  %v772_v15 = vmax.f32 %v734_v7, 0.0  ;;  %v664_v4 = vpop.permute.xlu0 %663 }
 0x2c1   : > { %v740_v14 = vadd.f32 %v739_v13, %v634_v9  ;;  %v773_v17 = vmax.f32 %v736_v10, 0.0 }
 0x2c2   : > { %v774_v16 = vmax.f32 %v738_v12, 0.0 }
 0x2c3   : > { %v775_v18 = vmax.f32 %v740_v14, 0.0 }
 0x2c4   : > { %v788_v19 = vpack.c.bf16 %v774_v16, %v772_v15 }
 0x2c5   : > { %v789_v21 = vpack.c.bf16 %v775_v18, %v773_v17  ;;  %v743_v22 = vpop.f32.mrb[4].mxu1 }
 0x2c6   : > { %v1268_v23 = vmul.bf16 3216621497, %v788_v19  ;;  %v744_v25 = vadd.f32 %v743_v22, %v639_v20  ;;  %v745_v27 = vpop.f32.mrb[5].mxu1 }
 0x2c7   : > { %v1269_v29 = vmul.bf16 3216621497, %v789_v21  ;;  %v746_v30 = vadd.f32 %v745_v27, %v639_v20  ;;  %v747_v31 = vpop.f32.mrb[6].mxu1 }
 0x2c8   : > { %1419 = vpow.bf16 %v1268_v23  ;;  %v748_v32 = vadd.f32 %v747_v31, %v644_v28  ;;  %v749_v33 = vpop.f32.mrb[7].mxu1  ;;  %v776_v35 = vmax.f32 %v744_v25, 0.0  ;;  %v873_v31 = vpop.permute.xlu1 %872 }
 0x2c9   : > { %1421 = vpow.bf16 %v1269_v29  ;;  %v750_v34 = vadd.f32 %v749_v33, %v644_v28  ;;  %v777_v37 = vmax.f32 %v746_v30, 0.0 }
 0x2ca   : > { %v778_v36 = vmax.f32 %v748_v32, 0.0 }
 0x2cb   : > { %v779_v38 = vmax.f32 %v750_v34, 0.0  ;;  %v878_v34 = vpop.permute.xlu0 %877 }
 0x2cc   : > { %v790_v39 = vpack.c.bf16 %v778_v36, %v776_v35 }
 0x2cd   : > { %v791_v43 = vpack.c.bf16 %v779_v38, %v777_v37  ;;  %v753_v44 = vpop.f32.mrb[8].mxu1 }
 0x2ce   : > { %v1270_v45 = vmul.bf16 3216621497, %v790_v39  ;;  %v754_v46 = vadd.f32 %v753_v44, %v649_v41  ;;  %v755_v47 = vpop.f32.mrb[9].mxu1 }
 0x2cf   : > { %v1271_v49 = vmul.bf16 3216621497, %v791_v43  ;;  %v756_v50 = vadd.f32 %v755_v47, %v649_v41  ;;  %v757_v51 = vpop.f32.mrb[10].mxu1 }
 0x2d0   : > { %1423 = vpow.bf16 %v1270_v45  ;;  %v758_v52 = vadd.f32 %v757_v51, %v654_v48  ;;  %v759_v53 = vpop.f32.mrb[11].mxu1  ;;  %v780_v55 = vmax.f32 %v754_v46, 0.0 }
 0x2d1   : > { %1425 = vpow.bf16 %v1271_v49  ;;  %v760_v54 = vadd.f32 %v759_v53, %v654_v48  ;;  %v781_v60 = vmax.f32 %v756_v50, 0.0 }
 0x2d2   : > { %v782_v58 = vmax.f32 %v758_v52, 0.0 }
 0x2d3   : > { %v1420_v59 = vpop.eup %1419  ;;  %v783_v61 = vmax.f32 %v760_v54, 0.0 }
 0x2d4   : > { %v1422_v62 = vpop.eup %1421  ;;  %v828_v63 = vadd.bf16 1065369472, %v1420_v59  ;;  %v792_v1 = vpack.c.bf16 %v782_v58, %v780_v55  ;;  %v883_v59 = vpop.permute.xlu1 %882 }
 0x2d5   : > { %v829_v2 = vadd.bf16 1065369472, %v1422_v62  ;;  %v793_v6 = vpack.c.bf16 %v783_v61, %v781_v60  ;;  %v763_v7 = vpop.f32.mrb[12].mxu1  ;;  %v888_v62 = vpop.permute.xlu0 %887 }
 0x2d6   : > { %1427 = vrcp.bf16 %v828_v63  ;;  %v1272_v8 = vmul.bf16 3216621497, %v792_v1  ;;  %v764_v9 = vadd.f32 %v763_v7, %v659_v5  ;;  %v765_v10 = vpop.f32.mrb[13].mxu1 }
 0x2d7   : > { %1429 = vrcp.bf16 %v829_v2  ;;  %v1273_v12 = vmul.bf16 3216621497, %v793_v6  ;;  %v766_v13 = vadd.f32 %v765_v10, %v659_v5  ;;  %v767_v14 = vpop.f32.mrb[14].mxu1 }
 0x2d8   : > { %1431 = vpow.bf16 %v1272_v8  ;;  %v768_v15 = vadd.f32 %v767_v14, %v664_v4  ;;  %v769_v16 = vpop.f32.mrb[15].mxu1  ;;  %v784_v18 = vmax.f32 %v764_v9, 0.0 }
 0x2d9   : > { %1433 = vpow.bf16 %v1273_v12  ;;  %v770_v17 = vadd.f32 %v769_v16, %v664_v4  ;;  %v785_v21 = vmax.f32 %v766_v13, 0.0 }
 0x2da   : > { %v786_v19 = vmax.f32 %v768_v15, 0.0 }
 0x2db   : > { %v1424_v20 = vpop.eup %1423  ;;  %v787_v22 = vmax.f32 %v770_v17, 0.0 }
 0x2dc   : > { %v1426_v23 = vpop.eup %1425  ;;  %v830_v25 = vadd.bf16 1065369472, %v1424_v20  ;;  %v794_v27 = vpack.c.bf16 %v786_v19, %v784_v18 }
 0x2dd   : > { %v831_v28 = vadd.bf16 1065369472, %v1426_v23  ;;  %v795_v29 = vpack.c.bf16 %v787_v22, %v785_v21  ;;  %v976_v30 = vpop.f32.mrb[16].mxu1 }
 0x2de   : > { %1435 = vrcp.bf16 %v830_v25  ;;  %v1274_v32 = vmul.bf16 3216621497, %v794_v27  ;;  %v978_v33 = vpop.f32.mrb[17].mxu1  ;;  %v977_v37 = vadd.f32 %v976_v30, %v873_v31  ;;  %v893_v25 = vpop.permute.xlu1 %892 }
 0x2df   : > { %1437 = vrcp.bf16 %v831_v28  ;;  %v1275_v35 = vmul.bf16 3216621497, %v795_v29  ;;  %v980_v36 = vpop.f32.mrb[18].mxu1  ;;  %v979_v43 = vadd.f32 %v978_v33, %v873_v31  ;;  %v898_v29 = vpop.permute.xlu0 %897 }
 0x2e0   : > { %1439 = vpow.bf16 %v1274_v32  ;;  %v981_v38 = vadd.f32 %v980_v36, %v878_v34  ;;  %v982_v39 = vpop.f32.mrb[19].mxu1 }
 0x2e1   : > { %v1428_v41 = vpop.eup %1427  ;;  %1441 = vpow.bf16 %v1275_v35  ;;  %v983_v44 = vadd.f32 %v982_v39, %v878_v34 }
 0x2e2   : > { %v1430_v45 = vpop.eup %1429  ;;  %v837_v46 = vmul.bf16 1065369472, %v1428_v41  ;;  %v1015_v47 = vpack.c.bf16 %v981_v38, %v977_v37 }
 0x2e3   : > { %v1432_v48 = vpop.eup %1431  ;;  %v839_v49 = vmul.bf16 1065369472, %v1430_v45  ;;  %v1016_v50 = vpack.c.bf16 %v983_v44, %v979_v43 }
 0x2e4   : > { %v1434_v51 = vpop.eup %1433  ;;  %v832_v52 = vadd.bf16 1065369472, %v1432_v48  ;;  %v1023_v53 = vmul.bf16 %v1015_v47, %v837_v46 }
 0x2e5   : > { %v833_v54 = vadd.bf16 1065369472, %v1434_v51  ;;  %v1024_v55 = vmul.bf16 %v1016_v50, %v839_v49  ;;  %v986_v58 = vpop.f32.mrb[20].mxu1  ;;  %v903_v50 = vpop.permute.xlu1 %902 }
 0x2e6   : > { %1443 = vrcp.bf16 %v832_v52  ;;  %v1031_v60 = vadd.bf16 %v1023_v53, %v1931_v3  ;;  %v988_v61 = vpop.f32.mrb[21].mxu1  ;;  %v987_v2 = vadd.f32 %v986_v58, %v883_v59  ;;  %v908_v53 = vpop.permute.xlu0 %907 }
 0x2e7   : > { %1445 = vrcp.bf16 %v833_v54  ;;  %v1032_v63 = vadd.bf16 %v1024_v55, %v1933_v11  ;;  %v990_v1 = vpop.f32.mrb[22].mxu1  ;;  %v989_v10 = vadd.f32 %v988_v61, %v883_v59 }
 0x2e8   : > { %v1039_v5 = vmax.bf16 %v1603_v0, %v1031_v60  ;;  %v991_v6 = vadd.f32 %v990_v1, %v888_v62  ;;  %v992_v7 = vpop.f32.mrb[23].mxu1 }
 0x2e9   : > { %v1436_v8 = vpop.eup %1435  ;;  %v1040_v9 = vmax.bf16 %v1603_v0, %v1032_v63  ;;  %v993_v4 = vadd.f32 %v992_v7, %v888_v62 }
 0x2ea   : > { %v1438_v12 = vpop.eup %1437  ;;  %v841_v13 = vmul.bf16 1065369472, %v1436_v8  ;;  %v1017_v3 = vpack.c.bf16 %v991_v6, %v987_v2 }
 0x2eb   : > { %v1440_v14 = vpop.eup %1439  ;;  %v1292_v15 = vcombine.low %v1039_v5, %v1040_v9  ;;  %v1293_v16 = vcombine.high %v1039_v5, %v1040_v9  ;;  %v843_v17 = vmul.bf16 1065369472, %v1438_v12  ;;  %v1018_v11 = vpack.c.bf16 %v993_v4, %v989_v10 }
 0x2ec   : > { %v1442_v18 = vpop.eup %1441  ;;  %v834_v19 = vadd.bf16 1065369472, %v1440_v14  ;;  %v1025_v20 = vmul.bf16 %v1017_v3, %v841_v13 }
 0x2ed   : > { %v835_v21 = vadd.bf16 1065369472, %v1442_v18  ;;  %1087 = vst [vmem:[%s1984_s22] sm:$0xff] %v1292_v15  ;;  %1088 = vst [vmem:[%s1984_s22 + $0x8] sm:$0xff] %v1293_v16  ;;  %v1026_v22 = vmul.bf16 %v1018_v11, %v843_v17  ;;  %v996_v23 = vpop.f32.mrb[24].mxu1 }
 0x2ee   : > { %1447 = vrcp.bf16 %v834_v19  ;;  %v1033_v27 = vadd.bf16 %v1025_v20, %v1937_v24  ;;  %v998_v28 = vpop.f32.mrb[25].mxu1  ;;  %v997_v33 = vadd.f32 %v996_v23, %v893_v25 }
 0x2ef   : > { %1449 = vrcp.bf16 %v835_v21  ;;  %v1034_v30 = vadd.bf16 %v1026_v22, %v1939_v26  ;;  %v1000_v31 = vpop.f32.mrb[26].mxu1  ;;  %v999_v38 = vadd.f32 %v998_v28, %v893_v25 }
 0x2f0   : > { %v1041_v32 = vmax.bf16 %v1603_v0, %v1033_v27  ;;  %v1001_v34 = vadd.f32 %v1000_v31, %v898_v29  ;;  %v1002_v35 = vpop.f32.mrb[27].mxu1 }
 0x2f1   : > { %v1444_v36 = vpop.eup %1443  ;;  %v1042_v37 = vmax.bf16 %v1603_v0, %v1034_v30  ;;  %v1003_v39 = vadd.f32 %v1002_v35, %v898_v29 }
 0x2f2   : > { %v1446_v41 = vpop.eup %1445  ;;  %v845_v24 = vmul.bf16 1065369472, %v1444_v36  ;;  %v1019_v43 = vpack.c.bf16 %v1001_v34, %v997_v33 }
 0x2f3   : > { %v1294_v44 = vcombine.low %v1041_v32, %v1042_v37  ;;  %v1295_v45 = vcombine.high %v1041_v32, %v1042_v37  ;;  %v847_v46 = vmul.bf16 1065369472, %v1446_v41  ;;  %v1020_v26 = vpack.c.bf16 %v1003_v39, %v999_v38 }
 0x2f4   : > { %v1027_v47 = vmul.bf16 %v1019_v43, %v845_v24 }
 0x2f5   : > { %1089 = vst [vmem:[%s1984_s22 + $0x10] sm:$0xff] %v1294_v44  ;;  %1090 = vst [vmem:[%s1984_s22 + $0x18] sm:$0xff] %v1295_v45  ;;  %v1028_v48 = vmul.bf16 %v1020_v26, %v847_v46  ;;  %v1006_v49 = vpop.f32.mrb[28].mxu1 }
 0x2f6   : > { %v1035_v51 = vadd.bf16 %v1027_v47, %v1943_v40  ;;  %v1008_v52 = vpop.f32.mrb[29].mxu1  ;;  %v1007_v59 = vadd.f32 %v1006_v49, %v903_v50 }
 0x2f7   : > { %v1036_v54 = vadd.bf16 %v1028_v48, %v1945_v42  ;;  %v1010_v55 = vpop.f32.mrb[30].mxu1  ;;  %v1009_v1 = vadd.f32 %v1008_v52, %v903_v50 }
 0x2f8   : > { %v1043_v58 = vmax.bf16 %v1603_v0, %v1035_v51  ;;  %v1011_v60 = vadd.f32 %v1010_v55, %v908_v53  ;;  %v1012_v61 = vpop.f32.mrb[31].mxu1 }
 0x2f9   : > { %v1448_v62 = vpop.eup %1447  ;;  %v1044_v63 = vmax.bf16 %v1603_v0, %v1036_v54  ;;  %v1013_v5 = vadd.f32 %v1012_v61, %v908_v53 }
 0x2fa   : > { %v1450_v40 = vpop.eup %1449  ;;  %v849_v2 = vmul.bf16 1065369472, %v1448_v62  ;;  %v1021_v6 = vpack.c.bf16 %v1011_v60, %v1007_v59 }
 0x2fb   : > { %v1296_v7 = vcombine.low %v1043_v58, %v1044_v63  ;;  %v1297_v42 = vcombine.high %v1043_v58, %v1044_v63  ;;  %v851_v8 = vmul.bf16 1065369472, %v1450_v40  ;;  %v1022_v9 = vpack.c.bf16 %v1013_v5, %v1009_v1 }
 0x2fc   : > { %v1029_v10 = vmul.bf16 %v1021_v6, %v849_v2 }
 0x2fd   : > { %1091 = vst [vmem:[%s1984_s22 + $0x20] sm:$0xff] %v1296_v7  ;;  %1092 = vst [vmem:[%s1984_s22 + $0x28] sm:$0xff] %v1297_v42  ;;  %v1030_v4 = vmul.bf16 %v1022_v9, %v851_v8 }
 0x2fe   : > { %v1037_v12 = vadd.bf16 %v1029_v10, %v1949_v56 }
 0x2ff   : > { %v1038_v13 = vadd.bf16 %v1030_v4, %v1951_v57 }
 0x300   : > { %v1045_v3 = vmax.bf16 %v1603_v0, %v1037_v12 }
 0x301   : > { %v1046_v14 = vmax.bf16 %v1603_v0, %v1038_v13 }
 0x303   : > { %v1298_v15 = vcombine.low %v1045_v3, %v1046_v14  ;;  %v1299_v56 = vcombine.high %v1045_v3, %v1046_v14 }
 0x305   : > { %1093 = vst [vmem:[%s1984_s22 + $0x30] sm:$0xff] %v1298_v15  ;;  %1094 = vst [vmem:[%s1984_s22 + $0x38] sm:$0xff] %v1299_v56 }
 0x306   : > { %1522 = shalt.err (!%p1519_p9)
}
 0x307   : > { %s1523_s6 = scalar_lea.hbm %s2009_s21, 1024  ;;  %s1527_s29 = scalar_lea.hbm %s2066_s4, 2048 }
 0x308   : > { %p1524_p1 = scmp.ne.s32.totalorder %s2009_s21, %s1523_s6  ;;  %p1528_p7 = scmp.lt.u32.totalorder %s2009_s21, %s2066_s4 }
 0x309   : > { %p1529_p13 = scmp.lt.u32.totalorder %s1527_s29, %s1523_s6  ;;  %p1531_p6 = scmp.lt.u32.totalorder %s1523_s6, %s2009_s21 }
 0x30a   : > { %p1525_p2 = pnand %p1524_p1, %p1729_p10 }
 0x30b   : > { %p1530_p4 = por %p1529_p13, %p1528_p7 }
 0x30c   : > { %p1526_p3 = pneg %p1525_p2 }
 0x30d   : > { %p1532_p8 = por %p1531_p6, %p1530_p4 }
 0x30f   : > { %p1533_p12 = pnand %p1532_p8, %p1526_p3 }
 0x311   : > { %1536 = shalt.err (!%p1533_p12)
}
 0x312   : > { %s1606_s11 = smov 128   ;;  %s1607_s27 = smov 8  }
 0x313   : > { %1330 = dma.vmem_to_hbm [thread:$0]  (%p1729_p10), %s2011_s23, 1024, %s2009_s21, %s1096_s18, %s1606_s11, %s1606_s11, %s1607_s27  }
 0x314 PF: > { %s1126_s14 = sand.u32 1, %s1575_s15   ;;  %p2084_p11 = scmp.ne.s32.totalorder %s2074_s26, 0 }
 0x315   : > { %p2085_p0 = scmp.ge.s32.totalorder %s1595_s20, 2  ;;  %s1127_s28 = scalar_lea.sflag [#allocation4], %s1126_s14 }
 0x317   : > { %p1341_p5 = pnand %p2085_p0, %p2084_p11 }
 0x319   : > { %1570 = dma.done.wait (!%p1341_p5), %s1127_s28, 1024  }
 0x31a   : > { %1572 = vsyncadd (!%p1341_p5), %s1127_s28, 4294966272  ;;  %s21_s20 = sadd.s32 1, %s1595_s20   ;;  %s2086_s15 = smov %s1579_s16 }
 0x31b   : > { %p18_p9 = scmp.ge.s32.totalorder %s21_s20, 4   ;;  %s2087_s16 = smov %s1583_s17 }
 0x31c   : > { %s2088_s17 = smov %s1738_s10  ;;  %s2089_s18 = smov %s1591_s19 }
 0x31d   : > { %s2090_s19 = smov %s2092_s5  ;;  %20 = sbr.rel (!%p18_p9) target bundleno = 7 (0x7), region = 92 }
 0x324   :  { %1132 = vsyncpa [#allocation3], 1 }
 0x325   :  { %1134 = vsyncpa [#allocation3 + $0x1], 1 }
 0x326   :  { %1135 = vsyncpa [#allocation6], 1 }
 0x327   :  { %1136 = vsyncpa [#allocation4], 1 }
 0x328   :  { %1138 = vsyncpa [#allocation4 + $0x1], 1 }

</bundles_post_ra>
